<compile_context>
chip_gen: v7x
topology: tpu7x:2x2x1
jax: 0.10.0
libtpu: 0.0.40
codegen_flags: <defaults>
</compile_context>

<pallas_src>
import functools

import jax
import jax.numpy as jnp
from jax.experimental import pallas as pl
from jax.experimental.pallas import tpu as pltpu

_NEG_BIG = -1e30                 # "minus infinity" without inf-inf NaN hazards
_LANE = 128
_SUBLANE = 8
_BLOCK_BUDGET = 4 * 1024 * 1024  # bytes per logits block (x2 double-buffered)
_SINGLE_TILE_C_MAX = 8192        # whole class axis in one tile below this
_DEFAULT_C_TILE = 4096
_VMEM_LIMIT = 48 * 1024 * 1024   # <= v7x's 64 MiB physical VMEM; ample on v5e/v6e


def _lse_single_kernel(x_ref, lse_ref, *, num_classes, mask_classes):
    """Per-row logsumexp when the whole class axis fits in one tile."""
    x = x_ref[...].astype(jnp.float32)                      # (Nt, Ct) upcast
    if mask_classes:  # trace-time: only emitted when the class axis is ragged
        lane = jax.lax.broadcasted_iota(jnp.int32, (1, x.shape[1]), 1)
        x = jnp.where(lane < num_classes, x, _NEG_BIG)
    m = jnp.max(x, axis=-1, keepdims=True)
    lse_ref[...] = m + jnp.log(jnp.sum(jnp.exp(x - m), axis=-1, keepdims=True))


def _lse_online_kernel(x_ref, lse_ref, m_sc, l_sc, *, num_classes, c_tile,
                       mask_classes):
    """Flash-style online logsumexp across class tiles (reduction axis last)."""
    k = pl.program_id(1)

    @pl.when(k == 0)
    def _():
        m_sc[...] = jnp.full_like(m_sc, _NEG_BIG)   # running row max
        l_sc[...] = jnp.zeros_like(l_sc)            # running exp-sum

    x = x_ref[...].astype(jnp.float32)              # (Nt, Ct) upcast per tile
    if mask_classes:  # trace-time gate; scalar bound folds k*c_tile away
        lane = jax.lax.broadcasted_iota(jnp.int32, (1, x.shape[1]), 1)
        x = jnp.where(lane < num_classes - k * c_tile, x, _NEG_BIG)

    m_new = jnp.maximum(m_sc[...], jnp.max(x, axis=-1, keepdims=True))
    l_sc[...] = jnp.exp(m_sc[...] - m_new) * l_sc[...] + jnp.sum(
        jnp.exp(x - m_new), axis=-1, keepdims=True)
    m_sc[...] = m_new

    @pl.when(k == pl.num_programs(1) - 1)
    def _():
        lse_ref[...] = m_sc[...] + jnp.log(l_sc[...])


def _round_up(x: int, m: int) -> int:
    return (x + m - 1) // m * m


def _pick_tiles(n, c, itemsize, n_tile, c_tile):
    """Lane-dense (8,128)-aligned tiles sized against a ~4 MiB block budget."""
    c_pad = _round_up(c, _LANE)
    if c_tile is None:
        c_tile = c_pad if c_pad <= _SINGLE_TILE_C_MAX else _DEFAULT_C_TILE
    else:
        c_tile = _round_up(c_tile, _LANE)
    c_tile = min(c_tile, c_pad)

    if n_tile is None:
        max_rows = max(_SUBLANE,
                       (_BLOCK_BUDGET // (c_tile * itemsize)) // _SUBLANE * _SUBLANE)
        n_tile = min(512, max_rows)
        # v7x has 2 TensorCores sharing HBM: keep >= 2 row tiles when N allows.
        if n > _SUBLANE:
            n_tile = min(n_tile, _round_up((n + 1) // 2, _SUBLANE))
    else:
        n_tile = _round_up(n_tile, _SUBLANE)
    n_tile = min(n_tile, _round_up(n, _SUBLANE))
    return n_tile, c_tile


@functools.partial(jax.jit, static_argnames=("n_tile", "c_tile"))
def cross_entropy_loss(logits: jax.Array, target: jax.Array, *,
                       n_tile: int | None = None,
                       c_tile: int | None = None) -> jax.Array:
    """Mean cross-entropy over the batch.

    logits: [N, C] float (bf16 or f32, streamed through VMEM in its own dtype);
    target: [N] integer class indices.
    Returns a float32 scalar (nn.CrossEntropyLoss default reduction='mean').
    """
    n, c = logits.shape
    itemsize = logits.dtype.itemsize
    n_tile, c_tile = _pick_tiles(n, c, itemsize, n_tile, c_tile)

    n_row_tiles = pl.cdiv(n, n_tile)
    n_col_tiles = pl.cdiv(c, c_tile)
    mask_classes = (c % c_tile) != 0   # only emit the ragged-lane mask if needed

    cost = pl.CostEstimate(
        flops=4 * n * c,
        transcendentals=n * c,
        bytes_accessed=n * c * itemsize + n * 4,
    )

    if n_col_tiles == 1:
        # Whole class axis in one tile: 1-D grid over rows, no scratch/pl.when.
        kernel = functools.partial(_lse_single_kernel, num_classes=c,
                                   mask_classes=mask_classes)
        lse = pl.pallas_call(
            kernel,
            out_shape=jax.ShapeDtypeStruct((n, 1), jnp.float32),
            grid_spec=pltpu.PrefetchScalarGridSpec(
                num_scalar_prefetch=0,
                grid=(n_row_tiles,),
                in_specs=[pl.BlockSpec((n_tile, c_tile), lambda i: (i, 0))],
                out_specs=pl.BlockSpec((n_tile, 1), lambda i: (i, 0)),
            ),
            compiler_params=pltpu.CompilerParams(
                dimension_semantics=("parallel",),
                vmem_limit_bytes=_VMEM_LIMIT),
            cost_estimate=cost,
        )(logits)
    else:
        # 2-D grid: rows (parallel) x class tiles (arbitrary, last / reduction).
        kernel = functools.partial(_lse_online_kernel, num_classes=c,
                                   c_tile=c_tile, mask_classes=mask_classes)
        lse = pl.pallas_call(
            kernel,
            out_shape=jax.ShapeDtypeStruct((n, 1), jnp.float32),
            grid_spec=pltpu.PrefetchScalarGridSpec(
                num_scalar_prefetch=0,
                grid=(n_row_tiles, n_col_tiles),
                in_specs=[pl.BlockSpec((n_tile, c_tile), lambda i, k: (i, k))],
                # per-row LSE: resident across the class axis, written once at
                # the last class tile, flushed when the row tile changes.
                out_specs=pl.BlockSpec((n_tile, 1), lambda i, k: (i, 0)),
                scratch_shapes=[
                    pltpu.VMEM((n_tile, 1), jnp.float32),   # m_i (running max)
                    pltpu.VMEM((n_tile, 1), jnp.float32),   # l_i (running sum)
                ],
            ),
            compiler_params=pltpu.CompilerParams(
                dimension_semantics=("parallel", "arbitrary"),
                vmem_limit_bytes=_VMEM_LIMIT),
            cost_estimate=cost,
        )(logits)

    # Target-logit gather: N elements, done in XLA outside the streaming kernel.
    tgt = target.astype(jnp.int32)
    picked = jnp.take_along_axis(logits, tgt[:, None], axis=-1)[:, 0]
    picked = picked.astype(jnp.float32)

    # per-sample loss = logsumexp(logits_i) - logits_i[target_i]; mean over N.
    return jnp.mean(lse[:, 0] - picked)


def _reference(logits, target):
    lg = logits.astype(jnp.float32)
    lse = jax.scipy.special.logsumexp(lg, axis=-1)
    picked = jnp.take_along_axis(
        lg, target[:, None].astype(jnp.int32), axis=-1)[:, 0]
    return jnp.mean(lse - picked)


if __name__ == "__main__":
    key = jax.random.PRNGKey(0)
    k1, k2, k3, k4, k5, k6 = jax.random.split(key, 6)

    # Case 1: small f32 inputs -> single class tile, 1-D grid, ragged lanes.
    n1, c1 = 8, 32
    logits1 = jax.random.normal(k1, (n1, c1), dtype=jnp.float32)
    target1 = jax.random.randint(k2, (n1,), 0, c1, dtype=jnp.int32)
    loss1 = jax.block_until_ready(cross_entropy_loss(logits1, target1))
    ref1 = _reference(logits1, target1)
    assert jnp.allclose(loss1, ref1, atol=1e-5, rtol=1e-5), (loss1, ref1)

    # Case 2: bf16 with forced tiny tiles -> 2-D grid, online logsumexp across
    # class tiles, ragged row/class boundary blocks with no wrapper-side pad.
    n2, c2 = 24, 300
    logits2 = jax.random.normal(k3, (n2, c2), dtype=jnp.bfloat16)
    target2 = jax.random.randint(k4, (n2,), 0, c2, dtype=jnp.int32)
    loss2 = jax.block_until_ready(
        cross_entropy_loss(logits2, target2, n_tile=8, c_tile=128))
    ref2 = _reference(logits2, target2)
    assert jnp.allclose(loss2, ref2, atol=2e-3, rtol=2e-3), (loss2, ref2)

    # Case 3: bf16 with automatic tiling -> single class tile, 2 row tiles.
    n3, c3 = 40, 1000
    logits3 = jax.random.normal(k5, (n3, c3), dtype=jnp.bfloat16)
    target3 = jax.random.randint(k6, (n3,), 0, c3, dtype=jnp.int32)
    loss3 = jax.block_until_ready(cross_entropy_loss(logits3, target3))
    ref3 = _reference(logits3, target3)
    assert jnp.allclose(loss3, ref3, atol=2e-3, rtol=2e-3), (loss3, ref3)

    print("KERNEL_OK")
</pallas_src>

<mosaic_0001>
module attributes {stable_mosaic.version = 11 : i64} {
  func.func @_lse_single_kernel(%arg0: i32, %arg1: memref<8x128xf32, #tpu.memory_space<vmem>>, %arg2: memref<8x1xf32, #tpu.memory_space<vmem>>) attributes {dimension_semantics = [#tpu.dimension_semantics<parallel>], iteration_bounds = array<i64: 1>, scalar_prefetch = 0 : i64, scratch_operands = 0 : i64, tpu.core_type = #tpu.core_type<tc>, window_params = [{transform_indices = @transform_0, window_bounds = array<i64: 8, 128>}, {transform_indices = @transform_1, window_bounds = array<i64: 8, 1>}]} {
    %c0 = arith.constant 0 : index
    %c0_0 = arith.constant 0 : index
    %0 = vector.load %arg1[%c0, %c0_0] : memref<8x128xf32, #tpu.memory_space<vmem>>, vector<8x128xf32>
    %1 = tpu.iota {dimensions = array<i32: 1>} : vector<1x128xi32>
    %c32_i32 = arith.constant 32 : i32
    %2 = vector.broadcast %c32_i32 : i32 to vector<1x128xi32>
    %3 = arith.cmpi slt, %1, %2 : vector<1x128xi32>
    %cst = arith.constant -1.000000e+30 : f32
    %4 = vector.shape_cast %3 : vector<1x128xi1> to vector<1x128xi1>
    %5 = vector.broadcast %4 : vector<1x128xi1> to vector<8x128xi1>
    %6 = vector.broadcast %cst : f32 to vector<8x128xf32>
    %7 = arith.select %5, %0, %6 : vector<8x128xi1>, vector<8x128xf32>
    %cst_1 = arith.constant dense<0xFF800000> : vector<8xf32>
    %8 = vector.multi_reduction <maximumf>, %7, %cst_1 [1] : vector<8x128xf32> to vector<8xf32>
    %9 = vector.shape_cast %8 : vector<8xf32> to vector<8x1xf32>
    %10 = vector.broadcast %9 : vector<8x1xf32> to vector<8x128xf32>
    %11 = arith.subf %7, %10 : vector<8x128xf32>
    %12 = math.exp %11 : vector<8x128xf32>
    %cst_2 = arith.constant dense<0.000000e+00> : vector<8xf32>
    %13 = vector.multi_reduction <add>, %12, %cst_2 [1] : vector<8x128xf32> to vector<8xf32>
    %14 = vector.shape_cast %13 : vector<8xf32> to vector<8x1xf32>
    %15 = math.log %14 : vector<8x1xf32>
    %16 = arith.addf %9, %15 : vector<8x1xf32>
    %c0_3 = arith.constant 0 : index
    %c0_4 = arith.constant 0 : index
    %17 = vector.load %arg2[%c0_3, %c0_4] : memref<8x1xf32, #tpu.memory_space<vmem>>, vector<8x1xf32>
    tpu.vector_store %arg2[%c0_3, %c0_4], %16 {strides = array<i32>} : memref<8x1xf32, #tpu.memory_space<vmem>>, vector<8x1xf32>,
    return
  }
  func.func @transform_0(%arg0: i32) -> (i32, i32) {
    %c0_i32 = arith.constant 0 : i32
    %c0_i32_0 = arith.constant 0 : i32
    return %arg0, %c0_i32 : i32, i32
  }
  func.func @transform_1(%arg0: i32) -> (i32, i32) {
    %c0_i32 = arith.constant 0 : i32
    %c0_i32_0 = arith.constant 0 : i32
    return %arg0, %c0_i32 : i32, i32
  }
}

</mosaic_0001>

<bundles_post_ra>
// kernel: cross_entropy_loss.1
= control target key start
LH: loop header
LB: loop body
LE: loop exit
PB: predicated region body
PF: predicated region fallthrough
CT: control target
= control target key end

     0   :  { %6 = vsyncpa [#allocation3], 0  ;;  %s73_s6 = smov [#allocation2]   ;;  %s99_s0 = inlined_call_operand.hbm [shape: f32[8,32], index: 0, kind: input, shape index: {}]   ;;  %s100_s1 = inlined_call_operand.vmem [shape: f32[8,1], index: 1, kind: output, shape index: {}]  }
   0x1   :  { %s13_s7 = sshll.u32 %s73_s6, 4  ;;  %s49_s10 = scalar_lea.hbm %s99_s0, 128  ;;  %s14_s7 = int_to_ptr.vmem [resolvable:$true] %s13_s7 }
   0x2   :  { %p50_p0 = scmp.ne.s32.totalorder %s99_s0, %s49_s10  ;;  %p53_p1 = scmp.lt.u32.totalorder %s49_s10, %s99_s0 }
   0x4   :  { %p55_p2 = pnand %p53_p1, %p50_p0 }
   0x6   :  { %58 = shalt.err (!%p55_p2)
}
   0x7   :  { %s59_s15 = scalar_lea.vmem %s14_s7, 128  ;;  %p64_p4 = scmp.lt.s32.totalorder %s14_s7, %s14_s7 }
   0x8   :  { %p60_p3 = scmp.ne.s32.totalorder %s14_s7, %s59_s15  ;;  %p65_p5 = scmp.lt.s32.totalorder %s59_s15, %s59_s15 }
   0xa   :  { %p66_p6 = por %p65_p5, %p64_p4 }
   0xc   :  { %p67_p7 = pnand %p66_p6, %p60_p3 }
   0xe   :  { %70 = shalt.err (!%p67_p7)
}
   0xf   :  { %16 = dma.hbm_to_vmem [thread:$0]  %s99_s0, 128, %s14_s7, [#allocation3]  }
  0x10   :  { %71 = dma.done.wait [#allocation3], 128  }
  0x11   :  { %72 = vsyncadd [#allocation3], 4294967168  ;;  %v21_v0 = vlaneseq  ;;  %v20_v2 = vld [vmem:[#allocation2] sm:$0xff]  ;;  %vm37_vm1 = vcmask 7168  }
  0x13   :  { %v22_v1 = vand.u32 127, %v21_v0 }
  0x15   :  { %vm23_vm0 = vcmp.lt.s32.totalorder %v22_v1, 32 }
  0x16   :  { %v26_v3 = vsel %vm23_vm0, %v20_v2, -1e+30 }
  0x17   :  { %27 = vmax.xlane.f32.xlu0 %v26_v3 }
  0xa4   :  { %v28_v4 = vpop.xlane.xlu0 %27 }
  0xa5   :  { %v29_v5 = vsub.f32 %v26_v3, %v28_v4 }
  0xa7   :  { %v30_v6 = vmul.f32 1.442695, %v29_v5 }
  0xa9   :  { %45 = vpow2.f32 %v30_v6 }
  0xb3   :  { %v46_v7 = vpop.eup %45 }
  0xb4   :  { %32 = vadd.xlane.f32.xlu0 %v46_v7 }
 0x141   :  { %v33_v8 = vpop.xlane.xlu0 %32 }
 0x142   :  { %47 = vlog2.f32 %v33_v8 }
 0x14c   :  { %v48_v9 = vpop.eup %47 }
 0x14d   :  { %v35_v10 = vmul.f32 0.6931472, %v48_v9 }
 0x14f   :  { %v36_v11 = vadd.f32 %v35_v10, %v28_v4 }
 0x151   :  { %38 = vst.msk [vmem:[%s100_s1] sm:$0xff] %vm37_vm1, %v36_v11 }
 0x152   :  { %43 = vsyncpa [#allocation3], 1 }

</bundles_post_ra>
